<compile_context>
chip_gen: v7x
topology: tpu7x:2x2x1
jax: 0.10.0
libtpu: 0.0.40
codegen_flags: <defaults>
</compile_context>

<pallas_src>
import functools

import numpy as np
import jax
import jax.numpy as jnp
from jax import lax
from jax.experimental import pallas as pl
from jax.experimental.pallas import tpu as pltpu


GATE_LANES = 128          # packed gate block: lanes [k*H:(k+1)*H) hold gate k


def _round_up(x, m):
    return ((x + m - 1) // m) * m


def lstm_kernel(pre_ref, whh_ref, wlin_ref, blin_ref, out_ref, h_ref, c_ref,
                *, T, H):
    """One time-chunk of the recurrence.

    pre_ref:  (Tt, Bp, 128)  x_t @ W_ih^T + b, gates packed [i|f|g|o] on lanes
    whh_ref:  (128, 128)     W_hh^T (bf16); rows >= H and cols >= 4H are zero
    wlin_ref: (128, Op)      linear W^T (bf16); rows >= H / cols >= O zero
    blin_ref: (1, Op)        linear bias (f32)
    out_ref:  (Bp, Op)
    h_ref, c_ref: (Bp, 128) f32 scratch carrying state across time chunks.
      Only lanes [0:H) are meaningful; padded lanes only ever multiply into
      zero weight rows, so they never affect the result.
    """
    Tt, Bp, Gp = pre_ref.shape
    chunk = pl.program_id(0)
    last = pl.num_programs(0) - 1

    @pl.when(chunk == 0)
    def _init():
        h_ref[...] = jnp.zeros_like(h_ref)
        c_ref[...] = jnp.zeros_like(c_ref)

    whh = whh_ref[...]                               # (128, 128) bf16 tile

    # Loop-invariant lane mask (hoisted: JAX does not CSE broadcasts):
    # lanes [2H,3H) are the cell-candidate gate (tanh); the rest are sigmoid.
    lane = lax.broadcasted_iota(jnp.int32, (Bp, Gp), 1)
    is_cell = (lane >= 2 * H) & (lane < 3 * H)

    needs_mask = (T % Tt) != 0                       # static Python bool
    base = chunk * Tt

    def step(t, carry):
        h, c = carry
        # Recurrent projection: (Bp,128)@(128,128) bf16 MXU, f32 accumulate.
        g = pre_ref[t] + jnp.dot(h.astype(whh.dtype), whh,
                                 preferred_element_type=jnp.float32)
        # Full-vreg activations + lane select (2 EUP ops + 1 VPU select).
        act = jnp.where(is_cell, jnp.tanh(g), jax.nn.sigmoid(g))
        # Realign each gate to lanes [0:H) with XLU rolls (i already aligned).
        gi = act
        gf = pltpu.roll(act, shift=Gp - 1 * H, axis=1)
        gg = pltpu.roll(act, shift=Gp - 2 * H, axis=1)
        go = pltpu.roll(act, shift=Gp - 3 * H, axis=1)
        c_new = gf * c + gi * gg
        h_new = go * jnp.tanh(c_new)
        if needs_mask:                               # only for a ragged last chunk
            valid = (base + t) < T
            h_new = jnp.where(valid, h_new, h)
            c_new = jnp.where(valid, c_new, c)
        return h_new, c_new

    # Short, fully-unrolled inner loop: bounds live ranges to one chunk while
    # giving the LLO scheduler the whole chunk body.
    h, c = lax.fori_loop(0, Tt, step, (h_ref[...], c_ref[...]), unroll=True)
    h_ref[...] = h
    c_ref[...] = c

    @pl.when(chunk == last)
    def _final():
        # Lane-dense (Op = 128) output store.
        out_ref[...] = (jnp.dot(h.astype(wlin_ref.dtype), wlin_ref[...],
                                preferred_element_type=jnp.float32)
                        + blin_ref[...])


def pack_params(params):
    """Repack PyTorch-layout weights once (model-load time, not per call)."""
    H = params["w_hh"].shape[1]
    O = params["w_lin"].shape[0]
    if 4 * H > GATE_LANES:
        # TODO(synk): fall back to one 128-lane block per gate when 4*H > 128.
        raise NotImplementedError("packed-gate kernel needs 4*hidden_size <= 128")
    Gp = GATE_LANES
    Op = _round_up(max(O, 128), 128)
    f32, bf16 = jnp.float32, jnp.bfloat16

    w_hh = params["w_hh"].astype(f32)                        # (4H, H)
    whh_p = (jnp.zeros((Gp, Gp), f32)
             .at[:H, :4 * H].set(w_hh.T).astype(bf16))       # (128, 128)
    wlin_p = (jnp.zeros((Gp, Op), f32)
              .at[:H, :O].set(params["w_lin"].astype(f32).T).astype(bf16))
    blin_p = jnp.zeros((1, Op), f32).at[0, :O].set(params["b_lin"].astype(f32))

    return {
        "w_ih": params["w_ih"].astype(f32),                  # (4H, I), used in XLA
        "bias": (params["b_ih"] + params["b_hh"]).astype(f32),  # (4H,)
        "whh_p": whh_p,
        "wlin_p": wlin_p,
        "blin_p": blin_p,
    }


@functools.partial(jax.jit,
                   static_argnames=("hidden_size", "output_size", "time_chunk"))
def lstm_forward(x_btf, packed, *, hidden_size, output_size, time_chunk=16):
    """x_btf: (B, T, I) batch-first input. Returns (B, output_size)."""
    B, T, I = x_btf.shape
    H, O = hidden_size, output_size
    Gp = GATE_LANES
    Op = packed["wlin_p"].shape[1]
    Bp = _round_up(max(B, 8), 8)          # fill the 8 sublanes
    # TODO(synk): for production batches, pad Bp toward the MXU M dim (128/256)
    # or pack independent sequences, and add a "parallel" batch grid axis so
    # v7x's second TensorCore gets used.
    Tt = min(time_chunk, T)
    num_chunks = pl.cdiv(T, Tt)
    Tpad = num_chunks * Tt

    f32 = jnp.float32

    # Non-recurrent input projection in plain XLA (K = I is tiny; XLA fuses it
    # with the transpose/pad). PyTorch gate order i|f|g|o over the first 4H
    # lanes is already the packed layout the kernel expects.
    pre = (jnp.einsum("bti,gi->tbg", x_btf.astype(f32), packed["w_ih"])
           + packed["bias"])                                   # (T, B, 4H)
    pre_p = jnp.zeros((Tpad, Bp, Gp), f32).at[:T, :B, :4 * H].set(pre)

    # Each streamed chunk is Tt*Bp*128*4 bytes; double-buffered this is far
    # below every generation's scoped-VMEM budget (v7x's 64 MiB included).
    grid_spec = pltpu.PrefetchScalarGridSpec(
        num_scalar_prefetch=0,
        grid=(num_chunks,),
        in_specs=[
            pl.BlockSpec((Tt, Bp, Gp), lambda c: (c, 0, 0)),   # streamed pre
            pl.BlockSpec((Gp, Gp), lambda c: (0, 0)),          # W_hh^T (bf16)
            pl.BlockSpec((Gp, Op), lambda c: (0, 0)),          # W_lin^T (bf16)
            pl.BlockSpec((1, Op), lambda c: (0, 0)),           # b_lin
        ],
        out_specs=pl.BlockSpec((Bp, Op), lambda c: (0, 0)),
        scratch_shapes=[pltpu.VMEM((Bp, Gp), f32),             # h carry
                        pltpu.VMEM((Bp, Gp), f32)],            # c carry
    )

    out = pl.pallas_call(
        functools.partial(lstm_kernel, T=T, H=H),
        out_shape=jax.ShapeDtypeStruct((Bp, Op), f32),
        grid_spec=grid_spec,
        compiler_params=pltpu.CompilerParams(
            # Time axis carries the recurrence -> "arbitrary".
            dimension_semantics=("arbitrary",),
            # v5e's scoped default is only 16 MiB; 32 MiB is safe on all gens.
            vmem_limit_bytes=32 * 1024 * 1024),
    )(pre_p, packed["whh_p"], packed["wlin_p"], packed["blin_p"])

    return out[:B, :O]


def make_params(key, input_size=5, hidden_size=32, output_size=1):
    """Deterministic synthetic parameters in PyTorch layout (uniform init)."""
    ks = jax.random.split(key, 6)
    H = hidden_size
    s = 1.0 / np.sqrt(H)
    u = lambda k, shp: jax.random.uniform(k, shp, jnp.float32, -s, s)
    return {
        "w_ih": u(ks[0], (4 * H, input_size)),   # weight_ih_l0
        "w_hh": u(ks[1], (4 * H, H)),            # weight_hh_l0
        "b_ih": u(ks[2], (4 * H,)),
        "b_hh": u(ks[3], (4 * H,)),
        "w_lin": u(ks[4], (output_size, H)),     # linear.weight
        "b_lin": u(ks[5], (output_size,)),       # linear.bias
    }


def lstm_reference(x_btf, params):
    """Pure-JAX f32 reference with identical semantics (for verification)."""
    B, T, I = x_btf.shape
    H = params["w_hh"].shape[1]
    wih_t = params["w_ih"].T
    whh_t = params["w_hh"].T
    b = (params["b_ih"] + params["b_hh"]).reshape(1, -1)
    h = jnp.zeros((B, H), jnp.float32)
    c = jnp.zeros((B, H), jnp.float32)
    for t in range(T):
        gates = x_btf[:, t, :] @ wih_t + h @ whh_t + b
        i_g = jax.nn.sigmoid(gates[:, 0 * H:1 * H])
        f_g = jax.nn.sigmoid(gates[:, 1 * H:2 * H])
        g_g = jnp.tanh(gates[:, 2 * H:3 * H])
        o_g = jax.nn.sigmoid(gates[:, 3 * H:4 * H])
        c = f_g * c + i_g * g_g
        h = o_g * jnp.tanh(c)
    return h @ params["w_lin"].T + params["b_lin"].reshape(1, -1)


if __name__ == "__main__":
    B, T, I, H, O = 2, 8, 5, 32, 1
    key = jax.random.PRNGKey(0)
    kx, kp = jax.random.split(key)
    x = jax.random.normal(kx, (B, T, I), jnp.float32)   # batch-first, like PyTorch
    params = make_params(kp, input_size=I, hidden_size=H, output_size=O)

    packed = pack_params(params)                         # once, at "model load"
    out = lstm_forward(x, packed, hidden_size=H, output_size=O)
    out = jax.block_until_ready(out)

    ref = lstm_reference(x, params)
    assert out.shape == (B, O)
    # W_hh / W_lin are stored bf16 (f32 accumulation), so tolerance is looser
    # than the all-f32 variant.
    assert np.allclose(np.asarray(out), np.asarray(ref), atol=2e-2, rtol=2e-2)
    print("KERNEL_OK")
</pallas_src>

<mosaic_0001>
module attributes {stable_mosaic.version = 11 : i64} {
  func.func @lstm_kernel(%arg0: i32, %arg1: memref<8x8x128xf32, #tpu.memory_space<vmem>>, %arg2: memref<128x128xbf16, #tpu.memory_space<vmem>>, %arg3: memref<128x128xbf16, #tpu.memory_space<vmem>>, %arg4: memref<1x128xf32, #tpu.memory_space<vmem>>, %arg5: memref<8x128xf32, #tpu.memory_space<vmem>>, %arg6: memref<8x128xf32, #tpu.memory_space<vmem>>, %arg7: memref<8x128xf32, #tpu.memory_space<vmem>>) attributes {dimension_semantics = [#tpu.dimension_semantics<arbitrary>], iteration_bounds = array<i64: 1>, scalar_prefetch = 0 : i64, scratch_operands = 2 : i64, tpu.core_type = #tpu.core_type<tc>, window_params = [{transform_indices = @transform_0, window_bounds = array<i64: 8, 8, 128>}, {pipeline_mode = #tpu.pipeline_mode<synchronous>, transform_indices = @transform_1, window_bounds = array<i64: 128, 128>}, {pipeline_mode = #tpu.pipeline_mode<synchronous>, transform_indices = @transform_2, window_bounds = array<i64: 128, 128>}, {pipeline_mode = #tpu.pipeline_mode<synchronous>, transform_indices = @transform_3, window_bounds = array<i64: 1, 128>}, {pipeline_mode = #tpu.pipeline_mode<synchronous>, transform_indices = @transform_4, window_bounds = array<i64: 8, 128>}]} {
    %c0_i32 = arith.constant 0 : i32
    %0 = arith.cmpi eq, %arg0, %c0_i32 : i32
    %1 = arith.extui %0 : i1 to i32
    %c0_i32_0 = arith.constant 0 : i32
    %2 = arith.cmpi ne, %1, %c0_i32_0 : i32
    scf.if %2 {
      %cst_67 = arith.constant 0.000000e+00 : f32
      %185 = vector.broadcast %cst_67 : f32 to vector<8x128xf32>
      %c0_68 = arith.constant 0 : index
      %c0_69 = arith.constant 0 : index
      %186 = vector.load %arg6[%c0_68, %c0_69] : memref<8x128xf32, #tpu.memory_space<vmem>>, vector<8x128xf32>
      tpu.vector_store %arg6[%c0_68, %c0_69], %185 {strides = array<i32>} : memref<8x128xf32, #tpu.memory_space<vmem>>, vector<8x128xf32>,
      %cst_70 = arith.constant 0.000000e+00 : f32
      %187 = vector.broadcast %cst_70 : f32 to vector<8x128xf32>
      %c0_71 = arith.constant 0 : index
      %c0_72 = arith.constant 0 : index
      %188 = vector.load %arg7[%c0_71, %c0_72] : memref<8x128xf32, #tpu.memory_space<vmem>>, vector<8x128xf32>
      tpu.vector_store %arg7[%c0_71, %c0_72], %187 {strides = array<i32>} : memref<8x128xf32, #tpu.memory_space<vmem>>, vector<8x128xf32>,
    } else {
    }
    %c0 = arith.constant 0 : index
    %c0_1 = arith.constant 0 : index
    %3 = vector.load %arg2[%c0, %c0_1] : memref<128x128xbf16, #tpu.memory_space<vmem>>, vector<128x128xbf16>
    %4 = tpu.iota {dimensions = array<i32: 1>} : vector<8x128xi32>
    %c64_i32 = arith.constant 64 : i32
    %5 = vector.broadcast %c64_i32 : i32 to vector<8x128xi32>
    %6 = arith.cmpi sge, %4, %5 : vector<8x128xi32>
    %c96_i32 = arith.constant 96 : i32
    %7 = vector.broadcast %c96_i32 : i32 to vector<8x128xi32>
    %8 = arith.cmpi slt, %4, %7 : vector<8x128xi32>
    %9 = arith.andi %6, %8 : vector<8x128xi1>
    %c0_2 = arith.constant 0 : index
    %c0_3 = arith.constant 0 : index
    %10 = vector.load %arg6[%c0_2, %c0_3] : memref<8x128xf32, #tpu.memory_space<vmem>>, vector<8x128xf32>
    %c0_4 = arith.constant 0 : index
    %c0_5 = arith.constant 0 : index
    %11 = vector.load %arg7[%c0_4, %c0_5] : memref<8x128xf32, #tpu.memory_space<vmem>>, vector<8x128xf32>
    %c0_i32_6 = arith.constant 0 : i32
    %12 = arith.index_cast %c0_i32_6 : i32 to index
    %c0_7 = arith.constant 0 : index
    %c0_8 = arith.constant 0 : index
    %13 = vector.load %arg1[%12, %c0_7, %c0_8] : memref<8x8x128xf32, #tpu.memory_space<vmem>>, vector<1x8x128xf32>
    %14 = vector.shape_cast %13 : vector<1x8x128xf32> to vector<8x128xf32>
    %15 = arith.truncf %10 : vector<8x128xf32> to vector<8x128xbf16>
    %cst = arith.constant dense<0.000000e+00> : vector<8x128xf32>
    %16 = tpu.matmul %15, %3, %cst {dimension_numbers = #tpu.dot_dimension_numbers<[1], [0], [0], [1], [0, 0, 1, 1], [], []>} : vector<8x128xbf16>, vector<128x128xbf16>, vector<8x128xf32> -> vector<8x128xf32>
    %17 = arith.addf %14, %16 : vector<8x128xf32>
    %18 = math.tanh %17 : vector<8x128xf32>
    %19 = arith.negf %17 : vector<8x128xf32>
    %20 = math.exp %19 : vector<8x128xf32>
    %cst_9 = arith.constant 1.000000e+00 : f32
    %21 = vector.broadcast %cst_9 : f32 to vector<8x128xf32>
    %22 = arith.addf %21, %20 : vector<8x128xf32>
    %23 = arith.divf %21, %22 : vector<8x128xf32>
    %24 = arith.select %9, %18, %23 : vector<8x128xi1>, vector<8x128xf32>
    %c96_i32_10 = arith.constant 96 : i32
    %25 = tpu.dynamic_rotate %24 by %c96_i32_10 dim 1 : vector<8x128xf32>, i32 -> vector<8x128xf32>
    %c64_i32_11 = arith.constant 64 : i32
    %26 = tpu.dynamic_rotate %24 by %c64_i32_11 dim 1 : vector<8x128xf32>, i32 -> vector<8x128xf32>
    %c32_i32 = arith.constant 32 : i32
    %27 = tpu.dynamic_rotate %24 by %c32_i32 dim 1 : vector<8x128xf32>, i32 -> vector<8x128xf32>
    %28 = arith.mulf %25, %11 : vector<8x128xf32>
    %29 = arith.mulf %24, %26 : vector<8x128xf32>
    %30 = arith.addf %28, %29 : vector<8x128xf32>
    %31 = math.tanh %30 : vector<8x128xf32>
    %32 = arith.mulf %27, %31 : vector<8x128xf32>
    %c1_i32 = arith.constant 1 : i32
    %33 = arith.index_cast %c1_i32 : i32 to index
    %c0_12 = arith.constant 0 : index
    %c0_13 = arith.constant 0 : index
    %34 = vector.load %arg1[%33, %c0_12, %c0_13] : memref<8x8x128xf32, #tpu.memory_space<vmem>>, vector<1x8x128xf32>
    %35 = vector.shape_cast %34 : vector<1x8x128xf32> to vector<8x128xf32>
    %36 = arith.truncf %32 : vector<8x128xf32> to vector<8x128xbf16>
    %cst_14 = arith.constant dense<0.000000e+00> : vector<8x128xf32>
    %37 = tpu.matmul %36, %3, %cst_14 {dimension_numbers = #tpu.dot_dimension_numbers<[1], [0], [0], [1], [0, 0, 1, 1], [], []>} : vector<8x128xbf16>, vector<128x128xbf16>, vector<8x128xf32> -> vector<8x128xf32>
    %38 = arith.addf %35, %37 : vector<8x128xf32>
    %39 = math.tanh %38 : vector<8x128xf32>
    %40 = arith.negf %38 : vector<8x128xf32>
    %41 = math.exp %40 : vector<8x128xf32>
    %cst_15 = arith.constant 1.000000e+00 : f32
    %42 = vector.broadcast %cst_15 : f32 to vector<8x128xf32>
    %43 = arith.addf %42, %41 : vector<8x128xf32>
    %44 = arith.divf %42, %43 : vector<8x128xf32>
    %45 = arith.select %9, %39, %44 : vector<8x128xi1>, vector<8x128xf32>
    %c96_i32_16 = arith.constant 96 : i32
    %46 = tpu.dynamic_rotate %45 by %c96_i32_16 dim 1 : vector<8x128xf32>, i32 -> vector<8x128xf32>
    %c64_i32_17 = arith.constant 64 : i32
    %47 = tpu.dynamic_rotate %45 by %c64_i32_17 dim 1 : vector<8x128xf32>, i32 -> vector<8x128xf32>
    %c32_i32_18 = arith.constant 32 : i32
    %48 = tpu.dynamic_rotate %45 by %c32_i32_18 dim 1 : vector<8x128xf32>, i32 -> vector<8x128xf32>
    %49 = arith.mulf %46, %30 : vector<8x128xf32>
    %50 = arith.mulf %45, %47 : vector<8x128xf32>
    %51 = arith.addf %49, %50 : vector<8x128xf32>
    %52 = math.tanh %51 : vector<8x128xf32>
    %53 = arith.mulf %48, %52 : vector<8x128xf32>
    %c2_i32 = arith.constant 2 : i32
    %54 = arith.index_cast %c2_i32 : i32 to index
    %c0_19 = arith.constant 0 : index
    %c0_20 = arith.constant 0 : index
    %55 = vector.load %arg1[%54, %c0_19, %c0_20] : memref<8x8x128xf32, #tpu.memory_space<vmem>>, vector<1x8x128xf32>
    %56 = vector.shape_cast %55 : vector<1x8x128xf32> to vector<8x128xf32>
    %57 = arith.truncf %53 : vector<8x128xf32> to vector<8x128xbf16>
    %cst_21 = arith.constant dense<0.000000e+00> : vector<8x128xf32>
    %58 = tpu.matmul %57, %3, %cst_21 {dimension_numbers = #tpu.dot_dimension_numbers<[1], [0], [0], [1], [0, 0, 1, 1], [], []>} : vector<8x128xbf16>, vector<128x128xbf16>, vector<8x128xf32> -> vector<8x128xf32>
    %59 = arith.addf %56, %58 : vector<8x128xf32>
    %60 = math.tanh %59 : vector<8x128xf32>
    %61 = arith.negf %59 : vector<8x128xf32>
    %62 = math.exp %61 : vector<8x128xf32>
    %cst_22 = arith.constant 1.000000e+00 : f32
    %63 = vector.broadcast %cst_22 : f32 to vector<8x128xf32>
    %64 = arith.addf %63, %62 : vector<8x128xf32>
    %65 = arith.divf %63, %64 : vector<8x128xf32>
    %66 = arith.select %9, %60, %65 : vector<8x128xi1>, vector<8x128xf32>
    %c96_i32_23 = arith.constant 96 : i32
    %67 = tpu.dynamic_rotate %66 by %c96_i32_23 dim 1 : vector<8x128xf32>, i32 -> vector<8x128xf32>
    %c64_i32_24 = arith.constant 64 : i32
    %68 = tpu.dynamic_rotate %66 by %c64_i32_24 dim 1 : vector<8x128xf32>, i32 -> vector<8x128xf32>
    %c32_i32_25 = arith.constant 32 : i32
    %69 = tpu.dynamic_rotate %66 by %c32_i32_25 dim 1 : vector<8x128xf32>, i32 -> vector<8x128xf32>
    %70 = arith.mulf %67, %51 : vector<8x128xf32>
    %71 = arith.mulf %66, %68 : vector<8x128xf32>
    %72 = arith.addf %70, %71 : vector<8x128xf32>
    %73 = math.tanh %72 : vector<8x128xf32>
    %74 = arith.mulf %69, %73 : vector<8x128xf32>
    %c3_i32 = arith.constant 3 : i32
    %75 = arith.index_cast %c3_i32 : i32 to index
    %c0_26 = arith.constant 0 : index
    %c0_27 = arith.constant 0 : index
    %76 = vector.load %arg1[%75, %c0_26, %c0_27] : memref<8x8x128xf32, #tpu.memory_space<vmem>>, vector<1x8x128xf32>
    %77 = vector.shape_cast %76 : vector<1x8x128xf32> to vector<8x128xf32>
    %78 = arith.truncf %74 : vector<8x128xf32> to vector<8x128xbf16>
    %cst_28 = arith.constant dense<0.000000e+00> : vector<8x128xf32>
    %79 = tpu.matmul %78, %3, %cst_28 {dimension_numbers = #tpu.dot_dimension_numbers<[1], [0], [0], [1], [0, 0, 1, 1], [], []>} : vector<8x128xbf16>, vector<128x128xbf16>, vector<8x128xf32> -> vector<8x128xf32>
    %80 = arith.addf %77, %79 : vector<8x128xf32>
    %81 = math.tanh %80 : vector<8x128xf32>
    %82 = arith.negf %80 : vector<8x128xf32>
    %83 = math.exp %82 : vector<8x128xf32>
    %cst_29 = arith.constant 1.000000e+00 : f32
    %84 = vector.broadcast %cst_29 : f32 to vector<8x128xf32>
    %85 = arith.addf %84, %83 : vector<8x128xf32>
    %86 = arith.divf %84, %85 : vector<8x128xf32>
    %87 = arith.select %9, %81, %86 : vector<8x128xi1>, vector<8x128xf32>
    %c96_i32_30 = arith.constant 96 : i32
    %88 = tpu.dynamic_rotate %87 by %c96_i32_30 dim 1 : vector<8x128xf32>, i32 -> vector<8x128xf32>
    %c64_i32_31 = arith.constant 64 : i32
    %89 = tpu.dynamic_rotate %87 by %c64_i32_31 dim 1 : vector<8x128xf32>, i32 -> vector<8x128xf32>
    %c32_i32_32 = arith.constant 32 : i32
    %90 = tpu.dynamic_rotate %87 by %c32_i32_32 dim 1 : vector<8x128xf32>, i32 -> vector<8x128xf32>
    %91 = arith.mulf %88, %72 : vector<8x128xf32>
    %92 = arith.mulf %87, %89 : vector<8x128xf32>
    %93 = arith.addf %91, %92 : vector<8x128xf32>
    %94 = math.tanh %93 : vector<8x128xf32>
    %95 = arith.mulf %90, %94 : vector<8x128xf32>
    %c4_i32 = arith.constant 4 : i32
    %96 = arith.index_cast %c4_i32 : i32 to index
    %c0_33 = arith.constant 0 : index
    %c0_34 = arith.constant 0 : index
    %97 = vector.load %arg1[%96, %c0_33, %c0_34] : memref<8x8x128xf32, #tpu.memory_space<vmem>>, vector<1x8x128xf32>
    %98 = vector.shape_cast %97 : vector<1x8x128xf32> to vector<8x128xf32>
    %99 = arith.truncf %95 : vector<8x128xf32> to vector<8x128xbf16>
    %cst_35 = arith.constant dense<0.000000e+00> : vector<8x128xf32>
    %100 = tpu.matmul %99, %3, %cst_35 {dimension_numbers = #tpu.dot_dimension_numbers<[1], [0], [0], [1], [0, 0, 1, 1], [], []>} : vector<8x128xbf16>, vector<128x128xbf16>, vector<8x128xf32> -> vector<8x128xf32>
    %101 = arith.addf %98, %100 : vector<8x128xf32>
    %102 = math.tanh %101 : vector<8x128xf32>
    %103 = arith.negf %101 : vector<8x128xf32>
    %104 = math.exp %103 : vector<8x128xf32>
    %cst_36 = arith.constant 1.000000e+00 : f32
    %105 = vector.broadcast %cst_36 : f32 to vector<8x128xf32>
    %106 = arith.addf %105, %104 : vector<8x128xf32>
    %107 = arith.divf %105, %106 : vector<8x128xf32>
    %108 = arith.select %9, %102, %107 : vector<8x128xi1>, vector<8x128xf32>
    %c96_i32_37 = arith.constant 96 : i32
    %109 = tpu.dynamic_rotate %108 by %c96_i32_37 dim 1 : vector<8x128xf32>, i32 -> vector<8x128xf32>
    %c64_i32_38 = arith.constant 64 : i32
    %110 = tpu.dynamic_rotate %108 by %c64_i32_38 dim 1 : vector<8x128xf32>, i32 -> vector<8x128xf32>
    %c32_i32_39 = arith.constant 32 : i32
    %111 = tpu.dynamic_rotate %108 by %c32_i32_39 dim 1 : vector<8x128xf32>, i32 -> vector<8x128xf32>
    %112 = arith.mulf %109, %93 : vector<8x128xf32>
    %113 = arith.mulf %108, %110 : vector<8x128xf32>
    %114 = arith.addf %112, %113 : vector<8x128xf32>
    %115 = math.tanh %114 : vector<8x128xf32>
    %116 = arith.mulf %111, %115 : vector<8x128xf32>
    %c5_i32 = arith.constant 5 : i32
    %117 = arith.index_cast %c5_i32 : i32 to index
    %c0_40 = arith.constant 0 : index
    %c0_41 = arith.constant 0 : index
    %118 = vector.load %arg1[%117, %c0_40, %c0_41] : memref<8x8x128xf32, #tpu.memory_space<vmem>>, vector<1x8x128xf32>
    %119 = vector.shape_cast %118 : vector<1x8x128xf32> to vector<8x128xf32>
    %120 = arith.truncf %116 : vector<8x128xf32> to vector<8x128xbf16>
    %cst_42 = arith.constant dense<0.000000e+00> : vector<8x128xf32>
    %121 = tpu.matmul %120, %3, %cst_42 {dimension_numbers = #tpu.dot_dimension_numbers<[1], [0], [0], [1], [0, 0, 1, 1], [], []>} : vector<8x128xbf16>, vector<128x128xbf16>, vector<8x128xf32> -> vector<8x128xf32>
    %122 = arith.addf %119, %121 : vector<8x128xf32>
    %123 = math.tanh %122 : vector<8x128xf32>
    %124 = arith.negf %122 : vector<8x128xf32>
    %125 = math.exp %124 : vector<8x128xf32>
    %cst_43 = arith.constant 1.000000e+00 : f32
    %126 = vector.broadcast %cst_43 : f32 to vector<8x128xf32>
    %127 = arith.addf %126, %125 : vector<8x128xf32>
    %128 = arith.divf %126, %127 : vector<8x128xf32>
    %129 = arith.select %9, %123, %128 : vector<8x128xi1>, vector<8x128xf32>
    %c96_i32_44 = arith.constant 96 : i32
    %130 = tpu.dynamic_rotate %129 by %c96_i32_44 dim 1 : vector<8x128xf32>, i32 -> vector<8x128xf32>
    %c64_i32_45 = arith.constant 64 : i32
    %131 = tpu.dynamic_rotate %129 by %c64_i32_45 dim 1 : vector<8x128xf32>, i32 -> vector<8x128xf32>
    %c32_i32_46 = arith.constant 32 : i32
    %132 = tpu.dynamic_rotate %129 by %c32_i32_46 dim 1 : vector<8x128xf32>, i32 -> vector<8x128xf32>
    %133 = arith.mulf %130, %114 : vector<8x128xf32>
    %134 = arith.mulf %129, %131 : vector<8x128xf32>
    %135 = arith.addf %133, %134 : vector<8x128xf32>
    %136 = math.tanh %135 : vector<8x128xf32>
    %137 = arith.mulf %132, %136 : vector<8x128xf32>
    %c6_i32 = arith.constant 6 : i32
    %138 = arith.index_cast %c6_i32 : i32 to index
    %c0_47 = arith.constant 0 : index
    %c0_48 = arith.constant 0 : index
    %139 = vector.load %arg1[%138, %c0_47, %c0_48] : memref<8x8x128xf32, #tpu.memory_space<vmem>>, vector<1x8x128xf32>
    %140 = vector.shape_cast %139 : vector<1x8x128xf32> to vector<8x128xf32>
    %141 = arith.truncf %137 : vector<8x128xf32> to vector<8x128xbf16>
    %cst_49 = arith.constant dense<0.000000e+00> : vector<8x128xf32>
    %142 = tpu.matmul %141, %3, %cst_49 {dimension_numbers = #tpu.dot_dimension_numbers<[1], [0], [0], [1], [0, 0, 1, 1], [], []>} : vector<8x128xbf16>, vector<128x128xbf16>, vector<8x128xf32> -> vector<8x128xf32>
    %143 = arith.addf %140, %142 : vector<8x128xf32>
    %144 = math.tanh %143 : vector<8x128xf32>
    %145 = arith.negf %143 : vector<8x128xf32>
    %146 = math.exp %145 : vector<8x128xf32>
    %cst_50 = arith.constant 1.000000e+00 : f32
    %147 = vector.broadcast %cst_50 : f32 to vector<8x128xf32>
    %148 = arith.addf %147, %146 : vector<8x128xf32>
    %149 = arith.divf %147, %148 : vector<8x128xf32>
    %150 = arith.select %9, %144, %149 : vector<8x128xi1>, vector<8x128xf32>
    %c96_i32_51 = arith.constant 96 : i32
    %151 = tpu.dynamic_rotate %150 by %c96_i32_51 dim 1 : vector<8x128xf32>, i32 -> vector<8x128xf32>
    %c64_i32_52 = arith.constant 64 : i32
    %152 = tpu.dynamic_rotate %150 by %c64_i32_52 dim 1 : vector<8x128xf32>, i32 -> vector<8x128xf32>
    %c32_i32_53 = arith.constant 32 : i32
    %153 = tpu.dynamic_rotate %150 by %c32_i32_53 dim 1 : vector<8x128xf32>, i32 -> vector<8x128xf32>
    %154 = arith.mulf %151, %135 : vector<8x128xf32>
    %155 = arith.mulf %150, %152 : vector<8x128xf32>
    %156 = arith.addf %154, %155 : vector<8x128xf32>
    %157 = math.tanh %156 : vector<8x128xf32>
    %158 = arith.mulf %153, %157 : vector<8x128xf32>
    %c7_i32 = arith.constant 7 : i32
    %159 = arith.index_cast %c7_i32 : i32 to index
    %c0_54 = arith.constant 0 : index
    %c0_55 = arith.constant 0 : index
    %160 = vector.load %arg1[%159, %c0_54, %c0_55] : memref<8x8x128xf32, #tpu.memory_space<vmem>>, vector<1x8x128xf32>
    %161 = vector.shape_cast %160 : vector<1x8x128xf32> to vector<8x128xf32>
    %162 = arith.truncf %158 : vector<8x128xf32> to vector<8x128xbf16>
    %cst_56 = arith.constant dense<0.000000e+00> : vector<8x128xf32>
    %163 = tpu.matmul %162, %3, %cst_56 {dimension_numbers = #tpu.dot_dimension_numbers<[1], [0], [0], [1], [0, 0, 1, 1], [], []>} : vector<8x128xbf16>, vector<128x128xbf16>, vector<8x128xf32> -> vector<8x128xf32>
    %164 = arith.addf %161, %163 : vector<8x128xf32>
    %165 = math.tanh %164 : vector<8x128xf32>
    %166 = arith.negf %164 : vector<8x128xf32>
    %167 = math.exp %166 : vector<8x128xf32>
    %cst_57 = arith.constant 1.000000e+00 : f32
    %168 = vector.broadcast %cst_57 : f32 to vector<8x128xf32>
    %169 = arith.addf %168, %167 : vector<8x128xf32>
    %170 = arith.divf %168, %169 : vector<8x128xf32>
    %171 = arith.select %9, %165, %170 : vector<8x128xi1>, vector<8x128xf32>
    %c96_i32_58 = arith.constant 96 : i32
    %172 = tpu.dynamic_rotate %171 by %c96_i32_58 dim 1 : vector<8x128xf32>, i32 -> vector<8x128xf32>
    %c64_i32_59 = arith.constant 64 : i32
    %173 = tpu.dynamic_rotate %171 by %c64_i32_59 dim 1 : vector<8x128xf32>, i32 -> vector<8x128xf32>
    %c32_i32_60 = arith.constant 32 : i32
    %174 = tpu.dynamic_rotate %171 by %c32_i32_60 dim 1 : vector<8x128xf32>, i32 -> vector<8x128xf32>
    %175 = arith.mulf %172, %156 : vector<8x128xf32>
    %176 = arith.mulf %171, %173 : vector<8x128xf32>
    %177 = arith.addf %175, %176 : vector<8x128xf32>
    %178 = math.tanh %177 : vector<8x128xf32>
    %179 = arith.mulf %174, %178 : vector<8x128xf32>
    %c8_i32 = arith.constant 8 : i32
    %c0_61 = arith.constant 0 : index
    %c0_62 = arith.constant 0 : index
    %180 = vector.load %arg6[%c0_61, %c0_62] : memref<8x128xf32, #tpu.memory_space<vmem>>, vector<8x128xf32>
    tpu.vector_store %arg6[%c0_61, %c0_62], %179 {strides = array<i32>} : memref<8x128xf32, #tpu.memory_space<vmem>>, vector<8x128xf32>,
    %c0_63 = arith.constant 0 : index
    %c0_64 = arith.constant 0 : index
    %181 = vector.load %arg7[%c0_63, %c0_64] : memref<8x128xf32, #tpu.memory_space<vmem>>, vector<8x128xf32>
    tpu.vector_store %arg7[%c0_63, %c0_64], %177 {strides = array<i32>} : memref<8x128xf32, #tpu.memory_space<vmem>>, vector<8x128xf32>,
    %c0_i32_65 = arith.constant 0 : i32
    %182 = arith.cmpi eq, %arg0, %c0_i32_65 : i32
    %183 = arith.extui %182 : i1 to i32
    %c0_i32_66 = arith.constant 0 : i32
    %184 = arith.cmpi ne, %183, %c0_i32_66 : i32
    scf.if %184 {
      %185 = arith.truncf %179 : vector<8x128xf32> to vector<8x128xbf16>
      %c0_67 = arith.constant 0 : index
      %c0_68 = arith.constant 0 : index
      %186 = vector.load %arg3[%c0_67, %c0_68] : memref<128x128xbf16, #tpu.memory_space<vmem>>, vector<128x128xbf16>
      %cst_69 = arith.constant dense<0.000000e+00> : vector<8x128xf32>
      %187 = tpu.matmul %185, %186, %cst_69 {dimension_numbers = #tpu.dot_dimension_numbers<[1], [0], [0], [1], [0, 0, 1, 1], [], []>} : vector<8x128xbf16>, vector<128x128xbf16>, vector<8x128xf32> -> vector<8x128xf32>
      %c0_70 = arith.constant 0 : index
      %c0_71 = arith.constant 0 : index
      %188 = vector.load %arg4[%c0_70, %c0_71] : memref<1x128xf32, #tpu.memory_space<vmem>>, vector<1x128xf32>
      %189 = vector.broadcast %188 : vector<1x128xf32> to vector<8x128xf32>
      %190 = arith.addf %187, %189 : vector<8x128xf32>
      %c0_72 = arith.constant 0 : index
      %c0_73 = arith.constant 0 : index
      %191 = vector.load %arg5[%c0_72, %c0_73] : memref<8x128xf32, #tpu.memory_space<vmem>>, vector<8x128xf32>
      tpu.vector_store %arg5[%c0_72, %c0_73], %190 {strides = array<i32>} : memref<8x128xf32, #tpu.memory_space<vmem>>, vector<8x128xf32>,
    } else {
    }
    return
  }
  func.func @transform_0(%arg0: i32) -> (i32, i32, i32) {
    %c0_i32 = arith.constant 0 : i32
    %c0_i32_0 = arith.constant 0 : i32
    %c0_i32_1 = arith.constant 0 : i32
    return %arg0, %c0_i32, %c0_i32_0 : i32, i32, i32
  }
  func.func @transform_1(%arg0: i32) -> (i32, i32) {
    %c0_i32 = arith.constant 0 : i32
    %c0_i32_0 = arith.constant 0 : i32
    %c0_i32_1 = arith.constant 0 : i32
    return %c0_i32, %c0_i32_0 : i32, i32
  }
  func.func @transform_2(%arg0: i32) -> (i32, i32) {
    %c0_i32 = arith.constant 0 : i32
    %c0_i32_0 = arith.constant 0 : i32
    %c0_i32_1 = arith.constant 0 : i32
    return %c0_i32, %c0_i32_0 : i32, i32
  }
  func.func @transform_3(%arg0: i32) -> (i32, i32) {
    %c0_i32 = arith.constant 0 : i32
    %c0_i32_0 = arith.constant 0 : i32
    %c0_i32_1 = arith.constant 0 : i32
    return %c0_i32, %c0_i32_0 : i32, i32
  }
  func.func @transform_4(%arg0: i32) -> (i32, i32) {
    %c0_i32 = arith.constant 0 : i32
    %c0_i32_0 = arith.constant 0 : i32
    %c0_i32_1 = arith.constant 0 : i32
    return %c0_i32, %c0_i32_0 : i32, i32
  }
}

</mosaic_0001>

<bundles_post_ra>
// kernel: lstm_forward.1
= control target key start
LH: loop header
LB: loop body
LE: loop exit
PB: predicated region body
PF: predicated region fallthrough
CT: control target
= control target key end

     0   :  { %v1099_v0 = vmov 0.0   ;;  %vm1100_vm0 = vmmov 0   ;;  %v1101_v9 = vmov 0.0|0.0   ;;  %v40_v18 = vlaneseq  ;;  %s1102_s6 = smov 32   ;;  %s1103_s7 = smov 96   ;;  %s1422_s1 = inlined_call_operand.vmem [shape: bf16[128,128], index: 1, kind: input, shape index: {}]   ;;  %s1423_s0 = inlined_call_operand.vmem [shape: f32[8,8,128], index: 0, kind: input, shape index: {}]   ;;  %s1424_s2 = inlined_call_operand.vmem [shape: bf16[128,128], index: 2, kind: input, shape index: {}]   ;;  %s1425_s3 = inlined_call_operand.vmem [shape: f32[1,128], index: 3, kind: input, shape index: {}]   ;;  %s1426_s4 = inlined_call_operand.vmem [shape: f32[8,128], index: 4, kind: output, shape index: {}]  }
   0x1   :  { %833 = vmatprep.subr.bf16.mxu0 %v1099_v0  ;;  %v1134_v1 = vld [vmem:[%s1422_s1] sm:$0xff]   ;;  %849 = vmatprep.mubr.msk.bf16.mxu0 %vm1100_vm0, %v1099_v0  ;;  %v1145_v2 = vld [vmem:[%s1422_s1 + $0x8] sm:$0xff]   ;;  %v1154_v3 = vld [vmem:[%s1422_s1 + $0x10] sm:$0xff]   ;;  %s1104_s8 = smov 64  }
   0x2   :  { %853 = vmatprep.subr.bf16.mxu1 %v1099_v0  ;;  %869 = vmatprep.mubr.msk.bf16.mxu1 %vm1100_vm0, %v1099_v0  ;;  %v1163_v4 = vld [vmem:[%s1422_s1 + $0x18] sm:$0xff]   ;;  %v1172_v5 = vld [vmem:[%s1422_s1 + $0x20] sm:$0xff]   ;;  %v1181_v6 = vld [vmem:[%s1422_s1 + $0x28] sm:$0xff]   ;;  %v41_v20 = vand.u32 127, %v40_v18 }
   0x3   :  { %834 = vmatpush3.bf16.msra.mxu0 %v1134_v1  ;;  %854 = vmatpush3.bf16.msra.mxu1 %v1134_v1  ;;  %v1190_v7 = vld [vmem:[%s1422_s1 + $0x30] sm:$0xff]   ;;  %v1199_v8 = vld [vmem:[%s1422_s1 + $0x38] sm:$0xff]   ;;  %v47_v10 = vld [vmem:[%s1423_s0] sm:$0xff] }
   0x4   :  { %835 = vmatprep.subr.bf16.mxu0 %v1099_v0  ;;  %855 = vmatprep.subr.bf16.mxu1 %v1099_v0  ;;  %vm42_vm1 = vcmp.ge.s32.totalorder %v41_v20, 64  ;;  %vm43_vm2 = vcmp.lt.s32.totalorder %v41_v20, 96  ;;  %v729_v34 = vld [vmem:[%s1423_s0 + $0x8] sm:$0xff]  ;;  %v731_v55 = vld [vmem:[%s1423_s0 + $0x10] sm:$0xff] }
   0x5   :  { %vm1229_vm3 = vmand %vm42_vm1, %vm43_vm2 }
   0x7   :  { %836 = vmatpush3.bf16.msra.mxu0 %v1145_v2  ;;  %856 = vmatpush3.bf16.msra.mxu1 %v1145_v2 }
   0x8   :  { %837 = vmatprep.subr.bf16.mxu0 %v1099_v0  ;;  %857 = vmatprep.subr.bf16.mxu1 %v1099_v0 }
   0xb   :  { %838 = vmatpush3.bf16.msra.mxu0 %v1154_v3  ;;  %858 = vmatpush3.bf16.msra.mxu1 %v1154_v3 }
   0xc   :  { %839 = vmatprep.subr.bf16.mxu0 %v1099_v0  ;;  %859 = vmatprep.subr.bf16.mxu1 %v1099_v0 }
   0xf   :  { %840 = vmatpush3.bf16.msra.mxu0 %v1163_v4  ;;  %860 = vmatpush3.bf16.msra.mxu1 %v1163_v4 }
  0x10   :  { %841 = vmatprep.subr.bf16.mxu0 %v1099_v0  ;;  %861 = vmatprep.subr.bf16.mxu1 %v1099_v0 }
  0x13   :  { %842 = vmatpush3.bf16.msra.mxu0 %v1172_v5  ;;  %862 = vmatpush3.bf16.msra.mxu1 %v1172_v5 }
  0x14   :  { %843 = vmatprep.subr.bf16.mxu0 %v1099_v0  ;;  %863 = vmatprep.subr.bf16.mxu1 %v1099_v0 }
  0x17   :  { %844 = vmatpush3.bf16.msra.mxu0 %v1181_v6  ;;  %864 = vmatpush3.bf16.msra.mxu1 %v1181_v6 }
  0x18   :  { %845 = vmatprep.subr.bf16.mxu0 %v1099_v0  ;;  %865 = vmatprep.subr.bf16.mxu1 %v1099_v0 }
  0x1b   :  { %846 = vmatpush3.bf16.msra.mxu0 %v1190_v7  ;;  %866 = vmatpush3.bf16.msra.mxu1 %v1190_v7 }
  0x1c   :  { %847 = vmatprep.subr.bf16.mxu0 %v1099_v0  ;;  %867 = vmatprep.subr.bf16.mxu1 %v1099_v0 }
  0x1f   :  { %848 = vmatpush3.bf16.msra.mxu0 %v1199_v8  ;;  %868 = vmatpush3.bf16.msra.mxu1 %v1199_v8 }
  0x20   :  { %873 = vmatprep.subr.bf16.mxu0 %v1099_v0  ;;  %893 = vmatprep.subr.bf16.mxu1 %v1099_v0 }
  0x22   :  { %850 = vmatmul.mubr.bf16.vlgmr.msra.gmra.mrb[0].mxu0 %v1101_v9 }
  0x23   :  { %874 = vmatpush3.bf16.msra.mxu0 %v1134_v1  ;;  %889 = vmatprep.mubr.msk.bf16.mxu0 %vm1100_vm0, %v1099_v0 }
  0x24   :  { %875 = vmatprep.subr.bf16.mxu0 %v1099_v0 }
  0x27   :  { %876 = vmatpush3.bf16.msra.mxu0 %v1145_v2 }
  0x28   :  { %877 = vmatprep.subr.bf16.mxu0 %v1099_v0 }
  0x2b   :  { %878 = vmatpush3.bf16.msra.mxu0 %v1154_v3 }
  0x2c   :  { %879 = vmatprep.subr.bf16.mxu0 %v1099_v0 }
  0x2f   :  { %880 = vmatpush3.bf16.msra.mxu0 %v1163_v4 }
  0x30   :  { %881 = vmatprep.subr.bf16.mxu0 %v1099_v0 }
  0x33   :  { %882 = vmatpush3.bf16.msra.mxu0 %v1172_v5 }
  0x34   :  { %883 = vmatprep.subr.bf16.mxu0 %v1099_v0 }
  0x37   :  { %884 = vmatpush3.bf16.msra.mxu0 %v1181_v6 }
  0x38   :  { %885 = vmatprep.subr.bf16.mxu0 %v1099_v0 }
  0x3b   :  { %886 = vmatpush3.bf16.msra.mxu0 %v1190_v7 }
  0x3c   :  { %887 = vmatprep.subr.bf16.mxu0 %v1099_v0 }
  0x3f   :  { %888 = vmatpush3.bf16.msra.mxu0 %v1199_v8 }
  0x40   :  { %913 = vmatprep.subr.bf16.mxu0 %v1099_v0 }
  0xf5   :  { %v131_v11 = vpop.f32.mrb[0].mxu0 }
  0xf6   :  { %v137_v12 = vadd.f32 %v131_v11, %v47_v10  ;;  %v851_v13 = vpop.f32.mrb[1].mxu0 }
  0xf7   :  { %v134_v14 = vpop.f32.mrb[2].mxu0 }
  0xf8   :  { %v728_v15 = vmul.f32 -1.442695, %v137_v12  ;;  %v852_v16 = vpop.f32.mrb[3].mxu0 }
  0xfa   :  { %1035 = vpow2.f32 %v728_v15 }
  0xfb   :  { %1037 = vtanh.f32 %v137_v12 }
 0x104   :  { %v1036_v17 = vpop.eup %1035 }
 0x105   :  { %v142_v19 = vadd.f32 1.0, %v1036_v17  ;;  %v1038_v22 = vpop.eup %1037 }
 0x107   :  { %1039 = vrcp.f32 %v142_v19 }
 0x111   :  { %v1040_v23 = vpop.eup %1039 }
 0x112   :  { %v145_v24 = vsel %vm1229_vm3, %v1038_v22, %v1040_v23  ;;  %v733_v22 = vld [vmem:[%s1423_s0 + $0x18] sm:$0xff] }
 0x113   :  { %150 = vrot.lane.b32.xlu1 %v145_v24, %s1102_s6  ;;  %146 = vrot.lane.b32.xlu0 %v145_v24, %s1103_s7 }
 0x117   :  { %148 = vrot.lane.b32.xlu0 %v145_v24, %s1104_s8 }
 0x185   :  { %v147_v25 = vpop.permute.xlu0 %146  ;;  %v151_v31 = vpop.permute.xlu1 %150 }
 0x186   :  { %v152_v27 = vmul.f32 0.0, %v147_v25 }
 0x189   :  { %v149_v26 = vpop.permute.xlu0 %148 }
 0x18a   :  { %v153_v28 = vmul.f32 %v149_v26, %v145_v24 }
 0x18c   :  { %v154_v29 = vadd.f32 %v153_v28, %v152_v27 }
 0x18e   :  { %1041 = vtanh.f32 %v154_v29 }
 0x198   :  { %v1042_v30 = vpop.eup %1041 }
 0x199   :  { %v156_v32 = vmul.f32 %v1042_v30, %v151_v31 }
 0x19b   :  { %v159_v33 = vpack.c.bf16 %v156_v32, %v156_v32 }
 0x19d   :  { %870 = vmatmul.mubr.bf16.vlgmr.msra.gmra.mrb[0].mxu1 %v159_v33 }
 0x19e   :  { %894 = vmatpush3.bf16.msra.mxu1 %v1134_v1  ;;  %909 = vmatprep.mubr.msk.bf16.mxu1 %vm1100_vm0, %v1099_v0 }
 0x19f   :  { %895 = vmatprep.subr.bf16.mxu1 %v1099_v0 }
 0x1a2   :  { %896 = vmatpush3.bf16.msra.mxu1 %v1145_v2 }
 0x1a3   :  { %897 = vmatprep.subr.bf16.mxu1 %v1099_v0 }
 0x1a6   :  { %898 = vmatpush3.bf16.msra.mxu1 %v1154_v3 }
 0x1a7   :  { %899 = vmatprep.subr.bf16.mxu1 %v1099_v0 }
 0x1aa   :  { %900 = vmatpush3.bf16.msra.mxu1 %v1163_v4 }
 0x1ab   :  { %901 = vmatprep.subr.bf16.mxu1 %v1099_v0 }
 0x1ae   :  { %902 = vmatpush3.bf16.msra.mxu1 %v1172_v5 }
 0x1af   :  { %903 = vmatprep.subr.bf16.mxu1 %v1099_v0 }
 0x1b2   :  { %904 = vmatpush3.bf16.msra.mxu1 %v1181_v6 }
 0x1b3   :  { %905 = vmatprep.subr.bf16.mxu1 %v1099_v0 }
 0x1b6   :  { %906 = vmatpush3.bf16.msra.mxu1 %v1190_v7 }
 0x1b7   :  { %907 = vmatprep.subr.bf16.mxu1 %v1099_v0 }
 0x1ba   :  { %908 = vmatpush3.bf16.msra.mxu1 %v1199_v8 }
 0x1bb   :  { %933 = vmatprep.subr.bf16.mxu1 %v1099_v0 }
 0x270   :  { %v194_v35 = vpop.f32.mrb[0].mxu1 }
 0x271   :  { %v200_v36 = vadd.f32 %v729_v34, %v194_v35  ;;  %v871_v37 = vpop.f32.mrb[1].mxu1 }
 0x272   :  { %v197_v38 = vpop.f32.mrb[2].mxu1 }
 0x273   :  { %v730_v39 = vmul.f32 -1.442695, %v200_v36  ;;  %v872_v40 = vpop.f32.mrb[3].mxu1 }
 0x275   :  { %1043 = vpow2.f32 %v730_v39 }
 0x276   :  { %1045 = vtanh.f32 %v200_v36 }
 0x27f   :  { %v1044_v41 = vpop.eup %1043 }
 0x280   :  { %v205_v42 = vadd.f32 1.0, %v1044_v41  ;;  %v1046_v43 = vpop.eup %1045 }
 0x282   :  { %1047 = vrcp.f32 %v205_v42 }
 0x28c   :  { %v1048_v44 = vpop.eup %1047 }
 0x28d   :  { %v208_v45 = vsel %vm1229_vm3, %v1046_v43, %v1048_v44  ;;  %v735_v43 = vld [vmem:[%s1423_s0 + $0x20] sm:$0xff] }
 0x28e   :  { %211 = vrot.lane.b32.xlu0 %v208_v45, %s1104_s8  ;;  %209 = vrot.lane.b32.xlu1 %v208_v45, %s1103_s7 }
 0x292   :  { %213 = vrot.lane.b32.xlu1 %v208_v45, %s1102_s6 }
 0x300   :  { %v212_v46 = vpop.permute.xlu0 %211  ;;  %v210_v47 = vpop.permute.xlu1 %209 }
 0x301   :  { %v216_v48 = vmul.f32 %v212_v46, %v208_v45  ;;  %v215_v49 = vmul.f32 %v210_v47, %v154_v29 }
 0x303   :  { %v217_v50 = vadd.f32 %v216_v48, %v215_v49 }
 0x304   :  { %v214_v52 = vpop.permute.xlu1 %213 }
 0x305   :  { %1049 = vtanh.f32 %v217_v50 }
 0x30f   :  { %v1050_v51 = vpop.eup %1049 }
 0x310   :  { %v219_v53 = vmul.f32 %v1050_v51, %v214_v52 }
 0x312   :  { %v222_v54 = vpack.c.bf16 %v219_v53, %v219_v53 }
 0x314   :  { %890 = vmatmul.mubr.bf16.vlgmr.msra.gmra.mrb[4].mxu0 %v222_v54 }
 0x315   :  { %914 = vmatpush3.bf16.msra.mxu0 %v1134_v1  ;;  %929 = vmatprep.mubr.msk.bf16.mxu0 %vm1100_vm0, %v1099_v0 }
 0x316   :  { %915 = vmatprep.subr.bf16.mxu0 %v1099_v0 }
 0x319   :  { %916 = vmatpush3.bf16.msra.mxu0 %v1145_v2 }
 0x31a   :  { %917 = vmatprep.subr.bf16.mxu0 %v1099_v0 }
 0x31d   :  { %918 = vmatpush3.bf16.msra.mxu0 %v1154_v3 }
 0x31e   :  { %919 = vmatprep.subr.bf16.mxu0 %v1099_v0 }
 0x321   :  { %920 = vmatpush3.bf16.msra.mxu0 %v1163_v4 }
 0x322   :  { %921 = vmatprep.subr.bf16.mxu0 %v1099_v0 }
 0x325   :  { %922 = vmatpush3.bf16.msra.mxu0 %v1172_v5 }
 0x326   :  { %923 = vmatprep.subr.bf16.mxu0 %v1099_v0 }
 0x329   :  { %924 = vmatpush3.bf16.msra.mxu0 %v1181_v6 }
 0x32a   :  { %925 = vmatprep.subr.bf16.mxu0 %v1099_v0 }
 0x32d   :  { %926 = vmatpush3.bf16.msra.mxu0 %v1190_v7 }
 0x32e   :  { %927 = vmatprep.subr.bf16.mxu0 %v1099_v0 }
 0x331   :  { %928 = vmatpush3.bf16.msra.mxu0 %v1199_v8 }
 0x332   :  { %953 = vmatprep.subr.bf16.mxu0 %v1099_v0 }
 0x3e7   :  { %v257_v56 = vpop.f32.mrb[4].mxu0 }
 0x3e8   :  { %v263_v57 = vadd.f32 %v731_v55, %v257_v56  ;;  %v891_v58 = vpop.f32.mrb[5].mxu0 }
 0x3e9   :  { %v260_v59 = vpop.f32.mrb[6].mxu0 }
 0x3ea   :  { %v732_v60 = vmul.f32 -1.442695, %v263_v57  ;;  %v892_v61 = vpop.f32.mrb[7].mxu0 }
 0x3ec   :  { %1051 = vpow2.f32 %v732_v60 }
 0x3ed   :  { %1053 = vtanh.f32 %v263_v57 }
 0x3f6   :  { %v1052_v62 = vpop.eup %1051 }
 0x3f7   :  { %v268_v63 = vadd.f32 1.0, %v1052_v62  ;;  %v1054_v9 = vpop.eup %1053 }
 0x3f9   :  { %1055 = vrcp.f32 %v268_v63 }
 0x403   :  { %v1056_v10 = vpop.eup %1055 }
 0x404   :  { %v271_v11 = vsel %vm1229_vm3, %v1054_v9, %v1056_v10 }
 0x405   :  { %274 = vrot.lane.b32.xlu1 %v271_v11, %s1104_s8  ;;  %272 = vrot.lane.b32.xlu0 %v271_v11, %s1103_s7 }
 0x409   :  { %276 = vrot.lane.b32.xlu0 %v271_v11, %s1102_s6 }
 0x477   :  { %v275_v12 = vpop.permute.xlu1 %274  ;;  %v273_v13 = vpop.permute.xlu0 %272 }
 0x478   :  { %v279_v14 = vmul.f32 %v275_v12, %v271_v11  ;;  %v278_v15 = vmul.f32 %v273_v13, %v217_v50 }
 0x47a   :  { %v280_v16 = vadd.f32 %v279_v14, %v278_v15 }
 0x47b   :  { %v277_v18 = vpop.permute.xlu0 %276 }
 0x47c   :  { %1057 = vtanh.f32 %v280_v16 }
 0x486   :  { %v1058_v17 = vpop.eup %1057 }
 0x487   :  { %v282_v19 = vmul.f32 %v1058_v17, %v277_v18 }
 0x489   :  { %v285_v20 = vpack.c.bf16 %v282_v19, %v282_v19 }
 0x48b   :  { %910 = vmatmul.mubr.bf16.vlgmr.msra.gmra.mrb[4].mxu1 %v285_v20 }
 0x48c   :  { %934 = vmatpush3.bf16.msra.mxu1 %v1134_v1  ;;  %949 = vmatprep.mubr.msk.bf16.mxu1 %vm1100_vm0, %v1099_v0 }
 0x48d   :  { %935 = vmatprep.subr.bf16.mxu1 %v1099_v0 }
 0x490   :  { %936 = vmatpush3.bf16.msra.mxu1 %v1145_v2 }
 0x491   :  { %937 = vmatprep.subr.bf16.mxu1 %v1099_v0 }
 0x494   :  { %938 = vmatpush3.bf16.msra.mxu1 %v1154_v3 }
 0x495   :  { %939 = vmatprep.subr.bf16.mxu1 %v1099_v0 }
 0x498   :  { %940 = vmatpush3.bf16.msra.mxu1 %v1163_v4 }
 0x499   :  { %941 = vmatprep.subr.bf16.mxu1 %v1099_v0 }
 0x49c   :  { %942 = vmatpush3.bf16.msra.mxu1 %v1172_v5 }
 0x49d   :  { %943 = vmatprep.subr.bf16.mxu1 %v1099_v0 }
 0x4a0   :  { %944 = vmatpush3.bf16.msra.mxu1 %v1181_v6 }
 0x4a1   :  { %945 = vmatprep.subr.bf16.mxu1 %v1099_v0 }
 0x4a4   :  { %946 = vmatpush3.bf16.msra.mxu1 %v1190_v7 }
 0x4a5   :  { %947 = vmatprep.subr.bf16.mxu1 %v1099_v0 }
 0x4a8   :  { %948 = vmatpush3.bf16.msra.mxu1 %v1199_v8 }
 0x4a9   :  { %973 = vmatprep.subr.bf16.mxu1 %v1099_v0 }
 0x55e   :  { %v320_v23 = vpop.f32.mrb[4].mxu1 }
 0x55f   :  { %v326_v24 = vadd.f32 %v733_v22, %v320_v23  ;;  %v911_v25 = vpop.f32.mrb[5].mxu1  ;;  %v739_v23 = vld [vmem:[%s1423_s0 + $0x30] sm:$0xff] }
 0x560   :  { %v323_v26 = vpop.f32.mrb[6].mxu1 }
 0x561   :  { %v734_v27 = vmul.f32 -1.442695, %v326_v24  ;;  %v912_v28 = vpop.f32.mrb[7].mxu1 }
 0x563   :  { %1059 = vpow2.f32 %v734_v27 }
 0x564   :  { %1061 = vtanh.f32 %v326_v24 }
 0x56d   :  { %v1060_v29 = vpop.eup %1059 }
 0x56e   :  { %v331_v30 = vadd.f32 1.0, %v1060_v29  ;;  %v1062_v31 = vpop.eup %1061 }
 0x570   :  { %1063 = vrcp.f32 %v331_v30 }
 0x57a   :  { %v1064_v32 = vpop.eup %1063 }
 0x57b   :  { %v334_v33 = vsel %vm1229_vm3, %v1062_v31, %v1064_v32 }
 0x57c   :  { %337 = vrot.lane.b32.xlu0 %v334_v33, %s1104_s8  ;;  %335 = vrot.lane.b32.xlu1 %v334_v33, %s1103_s7 }
 0x580   :  { %339 = vrot.lane.b32.xlu1 %v334_v33, %s1102_s6 }
 0x5ee   :  { %v338_v34 = vpop.permute.xlu0 %337  ;;  %v336_v35 = vpop.permute.xlu1 %335 }
 0x5ef   :  { %v342_v36 = vmul.f32 %v338_v34, %v334_v33  ;;  %v341_v37 = vmul.f32 %v336_v35, %v280_v16 }
 0x5f1   :  { %v343_v38 = vadd.f32 %v342_v36, %v341_v37 }
 0x5f2   :  { %v340_v40 = vpop.permute.xlu1 %339 }
 0x5f3   :  { %1065 = vtanh.f32 %v343_v38 }
 0x5fd   :  { %v1066_v39 = vpop.eup %1065 }
 0x5fe   :  { %v345_v41 = vmul.f32 %v1066_v39, %v340_v40 }
 0x600   :  { %v348_v42 = vpack.c.bf16 %v345_v41, %v345_v41 }
 0x602   :  { %930 = vmatmul.mubr.bf16.vlgmr.msra.gmra.mrb[8].mxu0 %v348_v42 }
 0x603   :  { %954 = vmatpush3.bf16.msra.mxu0 %v1134_v1  ;;  %969 = vmatprep.mubr.msk.bf16.mxu0 %vm1100_vm0, %v1099_v0 }
 0x604   :  { %955 = vmatprep.subr.bf16.mxu0 %v1099_v0 }
 0x607   :  { %956 = vmatpush3.bf16.msra.mxu0 %v1145_v2 }
 0x608   :  { %957 = vmatprep.subr.bf16.mxu0 %v1099_v0 }
 0x60b   :  { %958 = vmatpush3.bf16.msra.mxu0 %v1154_v3 }
 0x60c   :  { %959 = vmatprep.subr.bf16.mxu0 %v1099_v0 }
 0x60f   :  { %960 = vmatpush3.bf16.msra.mxu0 %v1163_v4 }
 0x610   :  { %961 = vmatprep.subr.bf16.mxu0 %v1099_v0 }
 0x613   :  { %962 = vmatpush3.bf16.msra.mxu0 %v1172_v5 }
 0x614   :  { %963 = vmatprep.subr.bf16.mxu0 %v1099_v0 }
 0x617   :  { %964 = vmatpush3.bf16.msra.mxu0 %v1181_v6 }
 0x618   :  { %965 = vmatprep.subr.bf16.mxu0 %v1099_v0 }
 0x61b   :  { %966 = vmatpush3.bf16.msra.mxu0 %v1190_v7 }
 0x61c   :  { %967 = vmatprep.subr.bf16.mxu0 %v1099_v0 }
 0x61f   :  { %968 = vmatpush3.bf16.msra.mxu0 %v1199_v8 }
 0x620   :  { %993 = vmatprep.subr.bf16.mxu0 %v1099_v0 }
 0x6d5   :  { %v383_v44 = vpop.f32.mrb[8].mxu0 }
 0x6d6   :  { %v389_v45 = vadd.f32 %v735_v43, %v383_v44  ;;  %v931_v46 = vpop.f32.mrb[9].mxu0  ;;  %v1027_v44 = vld [vmem:[%s1424_s2] sm:$0xff]  }
 0x6d7   :  { %v386_v47 = vpop.f32.mrb[10].mxu0  ;;  %v1029_v46 = vld [vmem:[%s1424_s2 + $0x10] sm:$0xff]  }
 0x6d8   :  { %v736_v48 = vmul.f32 -1.442695, %v389_v45  ;;  %v932_v49 = vpop.f32.mrb[11].mxu0  ;;  %v741_v47 = vld [vmem:[%s1423_s0 + $0x38] sm:$0xff] }
 0x6da   :  { %1067 = vpow2.f32 %v736_v48 }
 0x6db   :  { %1069 = vtanh.f32 %v389_v45  ;;  %v1028_v45 = vld [vmem:[%s1424_s2 + $0x8] sm:$0xff]  }
 0x6e4   :  { %v1068_v50 = vpop.eup %1067 }
 0x6e5   :  { %v394_v51 = vadd.f32 1.0, %v1068_v50  ;;  %v1070_v52 = vpop.eup %1069 }
 0x6e7   :  { %1071 = vrcp.f32 %v394_v51 }
 0x6f1   :  { %v1072_v53 = vpop.eup %1071 }
 0x6f2   :  { %v397_v54 = vsel %vm1229_vm3, %v1070_v52, %v1072_v53 }
 0x6f3   :  { %400 = vrot.lane.b32.xlu1 %v397_v54, %s1104_s8  ;;  %398 = vrot.lane.b32.xlu0 %v397_v54, %s1103_s7 }
 0x6f7   :  { %402 = vrot.lane.b32.xlu0 %v397_v54, %s1102_s6 }
 0x765   :  { %v401_v55 = vpop.permute.xlu1 %400  ;;  %v399_v56 = vpop.permute.xlu0 %398 }
 0x766   :  { %v405_v57 = vmul.f32 %v401_v55, %v397_v54  ;;  %v404_v58 = vmul.f32 %v399_v56, %v343_v38  ;;  %v1030_v55 = vld [vmem:[%s1424_s2 + $0x18] sm:$0xff]  }
 0x768   :  { %v406_v59 = vadd.f32 %v405_v57, %v404_v58  ;;  %v1031_v57 = vld [vmem:[%s1424_s2 + $0x20] sm:$0xff]   ;;  %v1032_v58 = vld [vmem:[%s1424_s2 + $0x28] sm:$0xff]  }
 0x769   :  { %v403_v61 = vpop.permute.xlu0 %402 }
 0x76a   :  { %1073 = vtanh.f32 %v406_v59 }
 0x774   :  { %v1074_v60 = vpop.eup %1073 }
 0x775   :  { %v408_v62 = vmul.f32 %v1074_v60, %v403_v61  ;;  %v1033_v60 = vld [vmem:[%s1424_s2 + $0x30] sm:$0xff]  }
 0x777   :  { %v411_v63 = vpack.c.bf16 %v408_v62, %v408_v62 }
 0x779   :  { %950 = vmatmul.mubr.bf16.vlgmr.msra.gmra.mrb[8].mxu1 %v411_v63  ;;  %v1034_v63 = vld [vmem:[%s1424_s2 + $0x38] sm:$0xff]  }
 0x77a   :  { %974 = vmatpush3.bf16.msra.mxu1 %v1134_v1  ;;  %989 = vmatprep.mubr.msk.bf16.mxu1 %vm1100_vm0, %v1099_v0  ;;  %v737_v1 = vld [vmem:[%s1423_s0 + $0x28] sm:$0xff] }
 0x77b   :  { %975 = vmatprep.subr.bf16.mxu1 %v1099_v0 }
 0x77e   :  { %976 = vmatpush3.bf16.msra.mxu1 %v1145_v2 }
 0x77f   :  { %977 = vmatprep.subr.bf16.mxu1 %v1099_v0 }
 0x782   :  { %978 = vmatpush3.bf16.msra.mxu1 %v1154_v3 }
 0x783   :  { %979 = vmatprep.subr.bf16.mxu1 %v1099_v0 }
 0x786   :  { %980 = vmatpush3.bf16.msra.mxu1 %v1163_v4 }
 0x787   :  { %981 = vmatprep.subr.bf16.mxu1 %v1099_v0 }
 0x78a   :  { %982 = vmatpush3.bf16.msra.mxu1 %v1172_v5 }
 0x78b   :  { %983 = vmatprep.subr.bf16.mxu1 %v1099_v0 }
 0x78e   :  { %984 = vmatpush3.bf16.msra.mxu1 %v1181_v6 }
 0x78f   :  { %985 = vmatprep.subr.bf16.mxu1 %v1099_v0 }
 0x792   :  { %986 = vmatpush3.bf16.msra.mxu1 %v1190_v7 }
 0x793   :  { %987 = vmatprep.subr.bf16.mxu1 %v1099_v0 }
 0x796   :  { %988 = vmatpush3.bf16.msra.mxu1 %v1199_v8 }
 0x84c   :  { %v446_v2 = vpop.f32.mrb[8].mxu1 }
 0x84d   :  { %v452_v3 = vadd.f32 %v737_v1, %v446_v2  ;;  %v951_v4 = vpop.f32.mrb[9].mxu1 }
 0x84e   :  { %v449_v5 = vpop.f32.mrb[10].mxu1 }
 0x84f   :  { %v738_v9 = vmul.f32 -1.442695, %v452_v3  ;;  %v952_v10 = vpop.f32.mrb[11].mxu1 }
 0x851   :  { %1075 = vpow2.f32 %v738_v9 }
 0x852   :  { %1077 = vtanh.f32 %v452_v3 }
 0x85b   :  { %v1076_v6 = vpop.eup %1075 }
 0x85c   :  { %v457_v11 = vadd.f32 1.0, %v1076_v6  ;;  %v1078_v7 = vpop.eup %1077 }
 0x85e   :  { %1079 = vrcp.f32 %v457_v11 }
 0x868   :  { %v1080_v12 = vpop.eup %1079 }
 0x869   :  { %v460_v8 = vsel %vm1229_vm3, %v1078_v7, %v1080_v12 }
 0x86a   :  { %463 = vrot.lane.b32.xlu0 %v460_v8, %s1104_s8  ;;  %461 = vrot.lane.b32.xlu1 %v460_v8, %s1103_s7 }
 0x86e   :  { %465 = vrot.lane.b32.xlu1 %v460_v8, %s1102_s6 }
 0x8dc   :  { %v464_v13 = vpop.permute.xlu0 %463  ;;  %v462_v14 = vpop.permute.xlu1 %461 }
 0x8dd   :  { %v468_v15 = vmul.f32 %v464_v13, %v460_v8  ;;  %v467_v16 = vmul.f32 %v462_v14, %v406_v59 }
 0x8df   :  { %v469_v17 = vadd.f32 %v468_v15, %v467_v16 }
 0x8e0   :  { %v466_v19 = vpop.permute.xlu1 %465 }
 0x8e1   :  { %1081 = vtanh.f32 %v469_v17 }
 0x8eb   :  { %v1082_v18 = vpop.eup %1081 }
 0x8ec   :  { %v471_v20 = vmul.f32 %v1082_v18, %v466_v19 }
 0x8ee   :  { %v474_v22 = vpack.c.bf16 %v471_v20, %v471_v20 }
 0x8f0   :  { %970 = vmatmul.mubr.bf16.vlgmr.msra.gmra.mrb[12].mxu0 %v474_v22 }
 0x8f1   :  { %1009 = vmatprep.mubr.msk.bf16.mxu0 %vm1100_vm0, %v1099_v0  ;;  %994 = vmatpush3.bf16.msra.mxu0 %v1027_v44 }
 0x8f2   :  { %995 = vmatprep.subr.bf16.mxu0 %v1099_v0 }
 0x8f5   :  { %996 = vmatpush3.bf16.msra.mxu0 %v1028_v45 }
 0x8f6   :  { %997 = vmatprep.subr.bf16.mxu0 %v1099_v0 }
 0x8f9   :  { %998 = vmatpush3.bf16.msra.mxu0 %v1029_v46 }
 0x8fa   :  { %999 = vmatprep.subr.bf16.mxu0 %v1099_v0 }
 0x8fd   :  { %1000 = vmatpush3.bf16.msra.mxu0 %v1030_v55 }
 0x8fe   :  { %1001 = vmatprep.subr.bf16.mxu0 %v1099_v0 }
 0x901   :  { %1002 = vmatpush3.bf16.msra.mxu0 %v1031_v57 }
 0x902   :  { %1003 = vmatprep.subr.bf16.mxu0 %v1099_v0 }
 0x905   :  { %1004 = vmatpush3.bf16.msra.mxu0 %v1032_v58 }
 0x906   :  { %1005 = vmatprep.subr.bf16.mxu0 %v1099_v0 }
 0x909   :  { %1006 = vmatpush3.bf16.msra.mxu0 %v1033_v60 }
 0x90a   :  { %1007 = vmatprep.subr.bf16.mxu0 %v1099_v0  ;;  %v743_v0 = vld [vmem:[%s1425_s3] ss:$0 sm:$0xff] }
 0x90d   :  { %1008 = vmatpush3.bf16.msra.mxu0 %v1034_v63 }
 0x9c3   :  { %v509_v24 = vpop.f32.mrb[12].mxu0 }
 0x9c4   :  { %v515_v25 = vadd.f32 %v739_v23, %v509_v24  ;;  %v971_v26 = vpop.f32.mrb[13].mxu0 }
 0x9c5   :  { %v512_v27 = vpop.f32.mrb[14].mxu0 }
 0x9c6   :  { %v740_v28 = vmul.f32 -1.442695, %v515_v25  ;;  %v972_v29 = vpop.f32.mrb[15].mxu0 }
 0x9c8   :  { %1083 = vpow2.f32 %v740_v28 }
 0x9c9   :  { %1085 = vtanh.f32 %v515_v25 }
 0x9d2   :  { %v1084_v30 = vpop.eup %1083 }
 0x9d3   :  { %v520_v31 = vadd.f32 1.0, %v1084_v30  ;;  %v1086_v32 = vpop.eup %1085 }
 0x9d5   :  { %1087 = vrcp.f32 %v520_v31 }
 0x9df   :  { %v1088_v33 = vpop.eup %1087 }
 0x9e0   :  { %v523_v34 = vsel %vm1229_vm3, %v1086_v32, %v1088_v33 }
 0x9e1   :  { %526 = vrot.lane.b32.xlu1 %v523_v34, %s1104_s8  ;;  %524 = vrot.lane.b32.xlu0 %v523_v34, %s1103_s7 }
 0x9e5   :  { %528 = vrot.lane.b32.xlu0 %v523_v34, %s1102_s6 }
 0xa53   :  { %v527_v35 = vpop.permute.xlu1 %526  ;;  %v525_v36 = vpop.permute.xlu0 %524 }
 0xa54   :  { %v531_v37 = vmul.f32 %v527_v35, %v523_v34  ;;  %v530_v38 = vmul.f32 %v525_v36, %v469_v17 }
 0xa56   :  { %v532_v39 = vadd.f32 %v531_v37, %v530_v38 }
 0xa57   :  { %v529_v41 = vpop.permute.xlu0 %528 }
 0xa58   :  { %1089 = vtanh.f32 %v532_v39 }
 0xa62   :  { %v1090_v40 = vpop.eup %1089 }
 0xa63   :  { %v534_v42 = vmul.f32 %v1090_v40, %v529_v41 }
 0xa65   :  { %v537_v43 = vpack.c.bf16 %v534_v42, %v534_v42 }
 0xa67   :  { %990 = vmatmul.mubr.bf16.vlgmr.msra.gmra.mrb[12].mxu1 %v537_v43 }
 0xb3a   :  { %v572_v48 = vpop.f32.mrb[12].mxu1 }
 0xb3b   :  { %v578_v49 = vadd.f32 %v741_v47, %v572_v48  ;;  %v991_v50 = vpop.f32.mrb[13].mxu1 }
 0xb3c   :  { %v575_v51 = vpop.f32.mrb[14].mxu1 }
 0xb3d   :  { %v742_v52 = vmul.f32 -1.442695, %v578_v49  ;;  %v992_v53 = vpop.f32.mrb[15].mxu1 }
 0xb3f   :  { %1091 = vpow2.f32 %v742_v52 }
 0xb40   :  { %1093 = vtanh.f32 %v578_v49 }
 0xb49   :  { %v1092_v54 = vpop.eup %1091 }
 0xb4a   :  { %v583_v56 = vadd.f32 1.0, %v1092_v54  ;;  %v1094_v59 = vpop.eup %1093 }
 0xb4c   :  { %1095 = vrcp.f32 %v583_v56 }
 0xb56   :  { %v1096_v61 = vpop.eup %1095 }
 0xb57   :  { %v586_v62 = vsel %vm1229_vm3, %v1094_v59, %v1096_v61 }
 0xb58   :  { %589 = vrot.lane.b32.xlu0 %v586_v62, %s1104_s8  ;;  %587 = vrot.lane.b32.xlu1 %v586_v62, %s1103_s7 }
 0xb5c   :  { %591 = vrot.lane.b32.xlu1 %v586_v62, %s1102_s6 }
 0xbca   :  { %v590_v1 = vpop.permute.xlu0 %589  ;;  %v588_v2 = vpop.permute.xlu1 %587 }
 0xbcb   :  { %v594_v3 = vmul.f32 %v590_v1, %v586_v62  ;;  %v593_v4 = vmul.f32 %v588_v2, %v532_v39 }
 0xbcd   :  { %v595_v21 = vadd.f32 %v594_v3, %v593_v4 }
 0xbce   :  { %v592_v9 = vpop.permute.xlu1 %591 }
 0xbcf   :  { %1097 = vtanh.f32 %v595_v21 }
 0xbd9   :  { %v1098_v5 = vpop.eup %1097 }
 0xbda   :  { %v597_v10 = vmul.f32 %v1098_v5, %v592_v9 }
 0xbdc   :  { %v603_v6 = vpack.c.bf16 %v597_v10, %v597_v10 }
 0xbde   :  { %1010 = vmatmul.mubr.bf16.vlgmr.msra.gmra.mrb[16].mxu0 %v603_v6 }
 0xcb1   :  { %v709_v11 = vpop.f32.mrb[16].mxu0 }
 0xcb2   :  { %v710_v7 = vadd.f32 %v743_v0, %v709_v11  ;;  %v1011_v12 = vpop.f32.mrb[17].mxu0 }
 0xcb3   :  { %v712_v8 = vpop.f32.mrb[18].mxu0 }
 0xcb4   :  { %715 = vst [vmem:[%s1426_s4] sm:$0xff] %v710_v7  ;;  %v1012_v13 = vpop.f32.mrb[19].mxu0 }

</bundles_post_ra>
